<compile_context>
chip_gen: v7x
topology: tpu7x:2x2x1
jax: 0.10.0
libtpu: 0.0.40
codegen_flags: <defaults>
</compile_context>

<pallas_src>
import math

import jax
import jax.numpy as jnp
from jax.experimental import pallas as pl

# ---- model hyper-parameters (small, consistent with the module) -------------
BATCH = 2
SEQ = 8
D_MODEL = 32
HEADS = 4
HEAD_DIM = D_MODEL // HEADS
DIM_FF = 64
BS = BATCH * SEQ
EPS_ATTN_NORM = float(DIM_FF)   # deliberate reproduction of nn.LayerNorm(input_size, dim_feedforward, dropout)
EPS_FF_NORM = 1e-5

W_ROWS = 2 * D_MODEL + DIM_FF           # 128  (w_qkvo rows | W1 rows | W2 rows)
W_COLS = 2 * D_MODEL + HEADS * D_MODEL  # 192  (Q | K | Wo-folded V, per head 32-wide)


def _encoder_layer_kernel(src_ref, w_ref, vec_ref, out_ref):
    x = src_ref[...]                                         # (BS, D) f32
    w = w_ref[...]                                           # (W_ROWS, W_COLS)
    vec = vec_ref[...]                                       # (8, W_COLS)

    w_qkvo = w[0:D_MODEL, :]                                 # (D, 192)  [Wq' | Wk' | Wvo'(H x 32)]
    w1 = w[D_MODEL:2 * D_MODEL, 0:DIM_FF]                    # (D, DIM_FF)
    w2 = w[2 * D_MODEL:2 * D_MODEL + DIM_FF, 0:D_MODEL]      # (DIM_FF, D)

    b_qk = vec[0:1, :]                                       # (1, 192)  (zeros over the Vo columns)
    b_attn = vec[1:2, 0:D_MODEL]                             # (1, D)    (b_attn@Wv + bv)@Wo + bo
    b1 = vec[2:3, 0:DIM_FF]                                  # (1, DIM_FF)
    b2 = vec[3:4, 0:D_MODEL]                                 # (1, D)

    # ---- self-attention sub-layer ------------------------------------------
    # LayerNorm (affine folded into the weights at pack time; eps quirk preserved).
    mu = jnp.mean(x, axis=-1, keepdims=True)
    var = jnp.mean((x - mu) ** 2, axis=-1, keepdims=True)
    xh = (x - mu) * jax.lax.rsqrt(var + EPS_ATTN_NORM)

    # One lane-dense matmul produces Q, K and the Wo-folded per-head V'.
    qkv = jnp.dot(xh, w_qkvo, preferred_element_type=jnp.float32) + b_qk     # (BS, 192)

    scale = 1.0 / math.sqrt(HEAD_DIM)
    parts = []
    for b in range(BATCH):                                   # static loops (2 x 4 tiny dots)
        lo = b * SEQ
        acc = None
        for h in range(HEADS):
            qh = qkv[lo:lo + SEQ, h * HEAD_DIM:(h + 1) * HEAD_DIM]                       # (S, Dh)
            kh = qkv[lo:lo + SEQ, D_MODEL + h * HEAD_DIM:D_MODEL + (h + 1) * HEAD_DIM]   # (S, Dh)
            vh = qkv[lo:lo + SEQ,
                     2 * D_MODEL + h * D_MODEL:2 * D_MODEL + (h + 1) * D_MODEL]          # (S, D)
            s = jax.lax.dot_general(qh, kh, (((1,), (1,)), ((), ())),
                                    preferred_element_type=jnp.float32) * scale          # (S, S)
            s = s - jnp.max(s, axis=-1, keepdims=True)
            p = jnp.exp(s)
            p = p * pl.reciprocal(jnp.sum(p, axis=-1, keepdims=True), approx=True)
            c = jnp.dot(p, vh, preferred_element_type=jnp.float32)                       # (S, D)
            acc = c if acc is None else acc + c
        parts.append(acc)
    attn = jnp.concatenate(parts, axis=0) + b_attn           # (BS, D), sublane-aligned concat

    x1 = x + attn                                            # dropout == identity (inference)

    # ---- feed-forward sub-layer --------------------------------------------
    mu2 = jnp.mean(x1, axis=-1, keepdims=True)
    var2 = jnp.mean((x1 - mu2) ** 2, axis=-1, keepdims=True)
    xh2 = (x1 - mu2) * jax.lax.rsqrt(var2 + EPS_FF_NORM)

    h1 = jnp.maximum(jnp.dot(xh2, w1, preferred_element_type=jnp.float32) + b1, 0.0)
    ff = jnp.dot(h1, w2, preferred_element_type=jnp.float32) + b2

    out_ref[...] = (x1 + ff).astype(out_ref.dtype)


@jax.jit
def transformer_encoder_layer(src, packed):
    """src: (B, S, D) float32; packed: {'w': (128,192), 'vec': (8,192)} parameter slabs."""
    B, S, D = src.shape
    x2d = src.reshape(B * S, D)
    args = (x2d, packed["w"], packed["vec"])

    def full_spec(a):
        n = a.ndim
        return pl.BlockSpec(a.shape, lambda *_, _n=n: (0,) * _n)

    out2d = pl.pallas_call(
        _encoder_layer_kernel,
        out_shape=jax.ShapeDtypeStruct((B * S, D), jnp.float32),
        in_specs=[full_spec(a) for a in args],
        out_specs=pl.BlockSpec((B * S, D), lambda *_: (0, 0)),
    )(*args)
    return out2d.reshape(B, S, D)


# ---- host-side parameter packing (LN-affine + Wo folding) --------------------
def _pack_params(p):
    g_a = p["g_attn"].T                                      # (D, 1) -> scales weight ROWS
    g_f = p["g_ff"].T

    wq = p["wq"] * g_a                                       # (D, D)
    wk = p["wk"] * g_a
    wvo = jnp.concatenate(
        [p["wv"][:, h * HEAD_DIM:(h + 1) * HEAD_DIM] @ p["wo"][h * HEAD_DIM:(h + 1) * HEAD_DIM, :]
         for h in range(HEADS)], axis=1) * g_a               # (D, H*D) = (32, 128)
    w_qkvo = jnp.concatenate([wq, wk, wvo], axis=1)          # (D, 192)

    w1 = p["w1"] * g_f                                       # (D, DIM_FF)

    W = jnp.zeros((W_ROWS, W_COLS), jnp.float32)
    W = W.at[0:D_MODEL, :].set(w_qkvo)
    W = W.at[D_MODEL:2 * D_MODEL, 0:DIM_FF].set(w1)
    W = W.at[2 * D_MODEL:2 * D_MODEL + DIM_FF, 0:D_MODEL].set(p["w2"])

    b_qk = jnp.zeros((1, W_COLS), jnp.float32)
    b_qk = b_qk.at[:, 0:D_MODEL].set(p["b_attn"] @ p["wq"] + p["bq"])
    b_qk = b_qk.at[:, D_MODEL:2 * D_MODEL].set(p["b_attn"] @ p["wk"] + p["bk"])

    b_attn_tot = (p["b_attn"] @ p["wv"] + p["bv"]) @ p["wo"] + p["bo"]       # (1, D)
    b1 = p["b_ff"] @ p["w1"] + p["b1"]                                       # (1, DIM_FF)

    V = jnp.zeros((8, W_COLS), jnp.float32)
    V = V.at[0:1, :].set(b_qk)
    V = V.at[1:2, 0:D_MODEL].set(b_attn_tot)
    V = V.at[2:3, 0:DIM_FF].set(b1)
    V = V.at[3:4, 0:D_MODEL].set(p["b2"])

    return dict(w=W, vec=V)


# ---- pure-JAX reference (same math, un-packed params) -----------------------
def _reference(src, p):
    def ln(x, g, b, eps):
        mu = jnp.mean(x, axis=-1, keepdims=True)
        var = jnp.mean((x - mu) ** 2, axis=-1, keepdims=True)
        return (x - mu) / jnp.sqrt(var + eps) * g + b

    xn = ln(src, p["g_attn"], p["b_attn"], EPS_ATTN_NORM)
    q = xn @ p["wq"] + p["bq"]
    k = xn @ p["wk"] + p["bk"]
    v = xn @ p["wv"] + p["bv"]
    B, S, D = src.shape
    qh = q.reshape(B, S, HEADS, HEAD_DIM).transpose(0, 2, 1, 3)
    kh = k.reshape(B, S, HEADS, HEAD_DIM).transpose(0, 2, 1, 3)
    vh = v.reshape(B, S, HEADS, HEAD_DIM).transpose(0, 2, 1, 3)
    s = jnp.einsum("bhqd,bhkd->bhqk", qh, kh) / math.sqrt(HEAD_DIM)
    a = jax.nn.softmax(s, axis=-1)
    ctx = jnp.einsum("bhqk,bhkd->bhqd", a, vh).transpose(0, 2, 1, 3).reshape(B, S, D)
    x1 = src + (ctx @ p["wo"] + p["bo"])
    xn2 = ln(x1, p["g_ff"], p["b_ff"], EPS_FF_NORM)
    h1 = jnp.maximum(xn2 @ p["w1"] + p["b1"], 0.0)
    return x1 + (h1 @ p["w2"] + p["b2"])


def _init_params(key):
    ks = jax.random.split(key, 10)
    scale = 0.02

    def lin(k, din, dout):
        kw, kb = jax.random.split(k)
        w = scale * jax.random.normal(kw, (din, dout), jnp.float32)   # stored as [in, out]
        b = scale * jax.random.normal(kb, (1, dout), jnp.float32)
        return w, b

    wq, bq = lin(ks[0], D_MODEL, D_MODEL)
    wk, bk = lin(ks[1], D_MODEL, D_MODEL)
    wv, bv = lin(ks[2], D_MODEL, D_MODEL)
    wo, bo = lin(ks[3], D_MODEL, D_MODEL)
    w1, b1 = lin(ks[4], D_MODEL, DIM_FF)
    w2, b2 = lin(ks[5], DIM_FF, D_MODEL)
    # non-trivial LayerNorm affine params to exercise the host-side folding
    g_attn = 1.0 + 0.1 * jax.random.normal(ks[6], (1, D_MODEL), jnp.float32)
    b_attn = 0.1 * jax.random.normal(ks[7], (1, D_MODEL), jnp.float32)
    g_ff = 1.0 + 0.1 * jax.random.normal(ks[8], (1, D_MODEL), jnp.float32)
    b_ff = 0.1 * jax.random.normal(ks[9], (1, D_MODEL), jnp.float32)
    return dict(
        g_attn=g_attn, b_attn=b_attn,
        wq=wq, bq=bq, wk=wk, bk=bk, wv=wv, bv=bv, wo=wo, bo=bo,
        g_ff=g_ff, b_ff=b_ff,
        w1=w1, b1=b1, w2=w2, b2=b2,
    )


if __name__ == "__main__":
    key = jax.random.PRNGKey(0)
    k_src, k_par = jax.random.split(key)
    src = jax.random.normal(k_src, (BATCH, SEQ, D_MODEL), jnp.float32)
    params = _init_params(k_par)
    packed = _pack_params(params)

    out = transformer_encoder_layer(src, packed)
    out = jax.block_until_ready(out)

    ref = _reference(src, params)
    assert out.shape == (BATCH, SEQ, D_MODEL)
    assert jnp.allclose(out, ref, atol=1e-3, rtol=1e-3), "mismatch vs pure-JAX reference"

    print("KERNEL_OK")
</pallas_src>

<mosaic_0001>
module attributes {stable_mosaic.version = 11 : i64} {
  func.func @_encoder_layer_kernel(%arg0: memref<16x32xf32, #tpu.memory_space<vmem>>, %arg1: memref<128x192xf32, #tpu.memory_space<vmem>>, %arg2: memref<8x192xf32, #tpu.memory_space<vmem>>, %arg3: memref<16x32xf32, #tpu.memory_space<vmem>>) attributes {dimension_semantics = [], scalar_prefetch = 0 : i64, scratch_operands = 0 : i64, tpu.core_type = #tpu.core_type<tc>} {
    %c0 = arith.constant 0 : index
    %c0_0 = arith.constant 0 : index
    %0 = vector.load %arg0[%c0, %c0_0] : memref<16x32xf32, #tpu.memory_space<vmem>>, vector<16x32xf32>
    %c0_1 = arith.constant 0 : index
    %c0_2 = arith.constant 0 : index
    %1 = vector.load %arg1[%c0_1, %c0_2] : memref<128x192xf32, #tpu.memory_space<vmem>>, vector<128x192xf32>
    %c0_3 = arith.constant 0 : index
    %c0_4 = arith.constant 0 : index
    %2 = vector.load %arg2[%c0_3, %c0_4] : memref<8x192xf32, #tpu.memory_space<vmem>>, vector<8x192xf32>
    %3 = vector.extract_strided_slice %1 {offsets = [0, 0], sizes = [32, 192], strides = [1, 1]} : vector<128x192xf32> to vector<32x192xf32>
    %4 = vector.extract_strided_slice %1 {offsets = [32, 0], sizes = [32, 64], strides = [1, 1]} : vector<128x192xf32> to vector<32x64xf32>
    %5 = vector.extract_strided_slice %1 {offsets = [64, 0], sizes = [64, 32], strides = [1, 1]} : vector<128x192xf32> to vector<64x32xf32>
    %6 = vector.extract_strided_slice %2 {offsets = [0, 0], sizes = [1, 192], strides = [1, 1]} : vector<8x192xf32> to vector<1x192xf32>
    %7 = vector.extract_strided_slice %2 {offsets = [1, 0], sizes = [1, 32], strides = [1, 1]} : vector<8x192xf32> to vector<1x32xf32>
    %8 = vector.extract_strided_slice %2 {offsets = [2, 0], sizes = [1, 64], strides = [1, 1]} : vector<8x192xf32> to vector<1x64xf32>
    %9 = vector.extract_strided_slice %2 {offsets = [3, 0], sizes = [1, 32], strides = [1, 1]} : vector<8x192xf32> to vector<1x32xf32>
    %cst = arith.constant dense<0.000000e+00> : vector<16xf32>
    %10 = vector.multi_reduction <add>, %0, %cst [1] : vector<16x32xf32> to vector<16xf32>
    %11 = vector.shape_cast %10 : vector<16xf32> to vector<16x1xf32>
    %cst_5 = arith.constant 3.200000e+01 : f32
    %12 = vector.broadcast %cst_5 : f32 to vector<16x1xf32>
    %13 = arith.divf %11, %12 : vector<16x1xf32>
    %14 = vector.broadcast %13 : vector<16x1xf32> to vector<16x32xf32>
    %15 = arith.subf %0, %14 : vector<16x32xf32>
    %16 = arith.mulf %15, %15 : vector<16x32xf32>
    %cst_6 = arith.constant dense<0.000000e+00> : vector<16xf32>
    %17 = vector.multi_reduction <add>, %16, %cst_6 [1] : vector<16x32xf32> to vector<16xf32>
    %18 = vector.shape_cast %17 : vector<16xf32> to vector<16x1xf32>
    %cst_7 = arith.constant 3.200000e+01 : f32
    %19 = vector.broadcast %cst_7 : f32 to vector<16x1xf32>
    %20 = arith.divf %18, %19 : vector<16x1xf32>
    %21 = vector.broadcast %13 : vector<16x1xf32> to vector<16x32xf32>
    %22 = arith.subf %0, %21 : vector<16x32xf32>
    %cst_8 = arith.constant 6.400000e+01 : f32
    %23 = vector.broadcast %cst_8 : f32 to vector<16x1xf32>
    %24 = arith.addf %20, %23 : vector<16x1xf32>
    %25 = math.rsqrt %24 : vector<16x1xf32>
    %26 = vector.broadcast %25 : vector<16x1xf32> to vector<16x32xf32>
    %27 = arith.mulf %22, %26 : vector<16x32xf32>
    %cst_9 = arith.constant dense<0.000000e+00> : vector<16x192xf32>
    %28 = tpu.matmul %27, %3, %cst_9 {dimension_numbers = #tpu.dot_dimension_numbers<[1], [0], [0], [1], [0, 0, 1, 1], [], []>} : vector<16x32xf32>, vector<32x192xf32>, vector<16x192xf32> -> vector<16x192xf32>
    %29 = vector.broadcast %6 : vector<1x192xf32> to vector<16x192xf32>
    %30 = arith.addf %28, %29 : vector<16x192xf32>
    %31 = vector.extract_strided_slice %30 {offsets = [0, 0], sizes = [8, 8], strides = [1, 1]} : vector<16x192xf32> to vector<8x8xf32>
    %32 = vector.extract_strided_slice %30 {offsets = [0, 32], sizes = [8, 8], strides = [1, 1]} : vector<16x192xf32> to vector<8x8xf32>
    %33 = vector.extract_strided_slice %30 {offsets = [0, 64], sizes = [8, 32], strides = [1, 1]} : vector<16x192xf32> to vector<8x32xf32>
    %cst_10 = arith.constant dense<0.000000e+00> : vector<8x8xf32>
    %34 = tpu.matmul %31, %32, %cst_10 {dimension_numbers = #tpu.dot_dimension_numbers<[1], [1], [0], [0], [0, 0, 1, 0], [], []>} : vector<8x8xf32>, vector<8x8xf32>, vector<8x8xf32> -> vector<8x8xf32>
    %cst_11 = arith.constant 0.353553385 : f32
    %35 = vector.broadcast %cst_11 : f32 to vector<8x8xf32>
    %36 = arith.mulf %34, %35 : vector<8x8xf32>
    %cst_12 = arith.constant dense<0xFF800000> : vector<8xf32>
    %37 = vector.multi_reduction <maximumf>, %36, %cst_12 [1] : vector<8x8xf32> to vector<8xf32>
    %38 = vector.shape_cast %37 : vector<8xf32> to vector<8x1xf32>
    %39 = vector.broadcast %38 : vector<8x1xf32> to vector<8x8xf32>
    %40 = arith.subf %36, %39 : vector<8x8xf32>
    %41 = math.exp %40 : vector<8x8xf32>
    %cst_13 = arith.constant dense<0.000000e+00> : vector<8xf32>
    %42 = vector.multi_reduction <add>, %41, %cst_13 [1] : vector<8x8xf32> to vector<8xf32>
    %43 = vector.shape_cast %42 : vector<8xf32> to vector<8x1xf32>
    %44 = tpu.reciprocal %43 {approx = true} : vector<8x1xf32> -> vector<8x1xf32>
    %45 = vector.broadcast %44 : vector<8x1xf32> to vector<8x8xf32>
    %46 = arith.mulf %41, %45 : vector<8x8xf32>
    %cst_14 = arith.constant dense<0.000000e+00> : vector<8x32xf32>
    %47 = tpu.matmul %46, %33, %cst_14 {dimension_numbers = #tpu.dot_dimension_numbers<[1], [0], [0], [1], [0, 0, 1, 1], [], []>} : vector<8x8xf32>, vector<8x32xf32>, vector<8x32xf32> -> vector<8x32xf32>
    %48 = vector.extract_strided_slice %30 {offsets = [0, 8], sizes = [8, 8], strides = [1, 1]} : vector<16x192xf32> to vector<8x8xf32>
    %49 = vector.extract_strided_slice %30 {offsets = [0, 40], sizes = [8, 8], strides = [1, 1]} : vector<16x192xf32> to vector<8x8xf32>
    %50 = vector.extract_strided_slice %30 {offsets = [0, 96], sizes = [8, 32], strides = [1, 1]} : vector<16x192xf32> to vector<8x32xf32>
    %cst_15 = arith.constant dense<0.000000e+00> : vector<8x8xf32>
    %51 = tpu.matmul %48, %49, %cst_15 {dimension_numbers = #tpu.dot_dimension_numbers<[1], [1], [0], [0], [0, 0, 1, 0], [], []>} : vector<8x8xf32>, vector<8x8xf32>, vector<8x8xf32> -> vector<8x8xf32>
    %cst_16 = arith.constant 0.353553385 : f32
    %52 = vector.broadcast %cst_16 : f32 to vector<8x8xf32>
    %53 = arith.mulf %51, %52 : vector<8x8xf32>
    %cst_17 = arith.constant dense<0xFF800000> : vector<8xf32>
    %54 = vector.multi_reduction <maximumf>, %53, %cst_17 [1] : vector<8x8xf32> to vector<8xf32>
    %55 = vector.shape_cast %54 : vector<8xf32> to vector<8x1xf32>
    %56 = vector.broadcast %55 : vector<8x1xf32> to vector<8x8xf32>
    %57 = arith.subf %53, %56 : vector<8x8xf32>
    %58 = math.exp %57 : vector<8x8xf32>
    %cst_18 = arith.constant dense<0.000000e+00> : vector<8xf32>
    %59 = vector.multi_reduction <add>, %58, %cst_18 [1] : vector<8x8xf32> to vector<8xf32>
    %60 = vector.shape_cast %59 : vector<8xf32> to vector<8x1xf32>
    %61 = tpu.reciprocal %60 {approx = true} : vector<8x1xf32> -> vector<8x1xf32>
    %62 = vector.broadcast %61 : vector<8x1xf32> to vector<8x8xf32>
    %63 = arith.mulf %58, %62 : vector<8x8xf32>
    %cst_19 = arith.constant dense<0.000000e+00> : vector<8x32xf32>
    %64 = tpu.matmul %63, %50, %cst_19 {dimension_numbers = #tpu.dot_dimension_numbers<[1], [0], [0], [1], [0, 0, 1, 1], [], []>} : vector<8x8xf32>, vector<8x32xf32>, vector<8x32xf32> -> vector<8x32xf32>
    %65 = arith.addf %47, %64 : vector<8x32xf32>
    %66 = vector.extract_strided_slice %30 {offsets = [0, 16], sizes = [8, 8], strides = [1, 1]} : vector<16x192xf32> to vector<8x8xf32>
    %67 = vector.extract_strided_slice %30 {offsets = [0, 48], sizes = [8, 8], strides = [1, 1]} : vector<16x192xf32> to vector<8x8xf32>
    %68 = vector.extract_strided_slice %30 {offsets = [0, 128], sizes = [8, 32], strides = [1, 1]} : vector<16x192xf32> to vector<8x32xf32>
    %cst_20 = arith.constant dense<0.000000e+00> : vector<8x8xf32>
    %69 = tpu.matmul %66, %67, %cst_20 {dimension_numbers = #tpu.dot_dimension_numbers<[1], [1], [0], [0], [0, 0, 1, 0], [], []>} : vector<8x8xf32>, vector<8x8xf32>, vector<8x8xf32> -> vector<8x8xf32>
    %cst_21 = arith.constant 0.353553385 : f32
    %70 = vector.broadcast %cst_21 : f32 to vector<8x8xf32>
    %71 = arith.mulf %69, %70 : vector<8x8xf32>
    %cst_22 = arith.constant dense<0xFF800000> : vector<8xf32>
    %72 = vector.multi_reduction <maximumf>, %71, %cst_22 [1] : vector<8x8xf32> to vector<8xf32>
    %73 = vector.shape_cast %72 : vector<8xf32> to vector<8x1xf32>
    %74 = vector.broadcast %73 : vector<8x1xf32> to vector<8x8xf32>
    %75 = arith.subf %71, %74 : vector<8x8xf32>
    %76 = math.exp %75 : vector<8x8xf32>
    %cst_23 = arith.constant dense<0.000000e+00> : vector<8xf32>
    %77 = vector.multi_reduction <add>, %76, %cst_23 [1] : vector<8x8xf32> to vector<8xf32>
    %78 = vector.shape_cast %77 : vector<8xf32> to vector<8x1xf32>
    %79 = tpu.reciprocal %78 {approx = true} : vector<8x1xf32> -> vector<8x1xf32>
    %80 = vector.broadcast %79 : vector<8x1xf32> to vector<8x8xf32>
    %81 = arith.mulf %76, %80 : vector<8x8xf32>
    %cst_24 = arith.constant dense<0.000000e+00> : vector<8x32xf32>
    %82 = tpu.matmul %81, %68, %cst_24 {dimension_numbers = #tpu.dot_dimension_numbers<[1], [0], [0], [1], [0, 0, 1, 1], [], []>} : vector<8x8xf32>, vector<8x32xf32>, vector<8x32xf32> -> vector<8x32xf32>
    %83 = arith.addf %65, %82 : vector<8x32xf32>
    %84 = vector.extract_strided_slice %30 {offsets = [0, 24], sizes = [8, 8], strides = [1, 1]} : vector<16x192xf32> to vector<8x8xf32>
    %85 = vector.extract_strided_slice %30 {offsets = [0, 56], sizes = [8, 8], strides = [1, 1]} : vector<16x192xf32> to vector<8x8xf32>
    %86 = vector.extract_strided_slice %30 {offsets = [0, 160], sizes = [8, 32], strides = [1, 1]} : vector<16x192xf32> to vector<8x32xf32>
    %cst_25 = arith.constant dense<0.000000e+00> : vector<8x8xf32>
    %87 = tpu.matmul %84, %85, %cst_25 {dimension_numbers = #tpu.dot_dimension_numbers<[1], [1], [0], [0], [0, 0, 1, 0], [], []>} : vector<8x8xf32>, vector<8x8xf32>, vector<8x8xf32> -> vector<8x8xf32>
    %cst_26 = arith.constant 0.353553385 : f32
    %88 = vector.broadcast %cst_26 : f32 to vector<8x8xf32>
    %89 = arith.mulf %87, %88 : vector<8x8xf32>
    %cst_27 = arith.constant dense<0xFF800000> : vector<8xf32>
    %90 = vector.multi_reduction <maximumf>, %89, %cst_27 [1] : vector<8x8xf32> to vector<8xf32>
    %91 = vector.shape_cast %90 : vector<8xf32> to vector<8x1xf32>
    %92 = vector.broadcast %91 : vector<8x1xf32> to vector<8x8xf32>
    %93 = arith.subf %89, %92 : vector<8x8xf32>
    %94 = math.exp %93 : vector<8x8xf32>
    %cst_28 = arith.constant dense<0.000000e+00> : vector<8xf32>
    %95 = vector.multi_reduction <add>, %94, %cst_28 [1] : vector<8x8xf32> to vector<8xf32>
    %96 = vector.shape_cast %95 : vector<8xf32> to vector<8x1xf32>
    %97 = tpu.reciprocal %96 {approx = true} : vector<8x1xf32> -> vector<8x1xf32>
    %98 = vector.broadcast %97 : vector<8x1xf32> to vector<8x8xf32>
    %99 = arith.mulf %94, %98 : vector<8x8xf32>
    %cst_29 = arith.constant dense<0.000000e+00> : vector<8x32xf32>
    %100 = tpu.matmul %99, %86, %cst_29 {dimension_numbers = #tpu.dot_dimension_numbers<[1], [0], [0], [1], [0, 0, 1, 1], [], []>} : vector<8x8xf32>, vector<8x32xf32>, vector<8x32xf32> -> vector<8x32xf32>
    %101 = arith.addf %83, %100 : vector<8x32xf32>
    %102 = vector.extract_strided_slice %30 {offsets = [8, 0], sizes = [8, 8], strides = [1, 1]} : vector<16x192xf32> to vector<8x8xf32>
    %103 = vector.extract_strided_slice %30 {offsets = [8, 32], sizes = [8, 8], strides = [1, 1]} : vector<16x192xf32> to vector<8x8xf32>
    %104 = vector.extract_strided_slice %30 {offsets = [8, 64], sizes = [8, 32], strides = [1, 1]} : vector<16x192xf32> to vector<8x32xf32>
    %cst_30 = arith.constant dense<0.000000e+00> : vector<8x8xf32>
    %105 = tpu.matmul %102, %103, %cst_30 {dimension_numbers = #tpu.dot_dimension_numbers<[1], [1], [0], [0], [0, 0, 1, 0], [], []>} : vector<8x8xf32>, vector<8x8xf32>, vector<8x8xf32> -> vector<8x8xf32>
    %cst_31 = arith.constant 0.353553385 : f32
    %106 = vector.broadcast %cst_31 : f32 to vector<8x8xf32>
    %107 = arith.mulf %105, %106 : vector<8x8xf32>
    %cst_32 = arith.constant dense<0xFF800000> : vector<8xf32>
    %108 = vector.multi_reduction <maximumf>, %107, %cst_32 [1] : vector<8x8xf32> to vector<8xf32>
    %109 = vector.shape_cast %108 : vector<8xf32> to vector<8x1xf32>
    %110 = vector.broadcast %109 : vector<8x1xf32> to vector<8x8xf32>
    %111 = arith.subf %107, %110 : vector<8x8xf32>
    %112 = math.exp %111 : vector<8x8xf32>
    %cst_33 = arith.constant dense<0.000000e+00> : vector<8xf32>
    %113 = vector.multi_reduction <add>, %112, %cst_33 [1] : vector<8x8xf32> to vector<8xf32>
    %114 = vector.shape_cast %113 : vector<8xf32> to vector<8x1xf32>
    %115 = tpu.reciprocal %114 {approx = true} : vector<8x1xf32> -> vector<8x1xf32>
    %116 = vector.broadcast %115 : vector<8x1xf32> to vector<8x8xf32>
    %117 = arith.mulf %112, %116 : vector<8x8xf32>
    %cst_34 = arith.constant dense<0.000000e+00> : vector<8x32xf32>
    %118 = tpu.matmul %117, %104, %cst_34 {dimension_numbers = #tpu.dot_dimension_numbers<[1], [0], [0], [1], [0, 0, 1, 1], [], []>} : vector<8x8xf32>, vector<8x32xf32>, vector<8x32xf32> -> vector<8x32xf32>
    %119 = vector.extract_strided_slice %30 {offsets = [8, 8], sizes = [8, 8], strides = [1, 1]} : vector<16x192xf32> to vector<8x8xf32>
    %120 = vector.extract_strided_slice %30 {offsets = [8, 40], sizes = [8, 8], strides = [1, 1]} : vector<16x192xf32> to vector<8x8xf32>
    %121 = vector.extract_strided_slice %30 {offsets = [8, 96], sizes = [8, 32], strides = [1, 1]} : vector<16x192xf32> to vector<8x32xf32>
    %cst_35 = arith.constant dense<0.000000e+00> : vector<8x8xf32>
    %122 = tpu.matmul %119, %120, %cst_35 {dimension_numbers = #tpu.dot_dimension_numbers<[1], [1], [0], [0], [0, 0, 1, 0], [], []>} : vector<8x8xf32>, vector<8x8xf32>, vector<8x8xf32> -> vector<8x8xf32>
    %cst_36 = arith.constant 0.353553385 : f32
    %123 = vector.broadcast %cst_36 : f32 to vector<8x8xf32>
    %124 = arith.mulf %122, %123 : vector<8x8xf32>
    %cst_37 = arith.constant dense<0xFF800000> : vector<8xf32>
    %125 = vector.multi_reduction <maximumf>, %124, %cst_37 [1] : vector<8x8xf32> to vector<8xf32>
    %126 = vector.shape_cast %125 : vector<8xf32> to vector<8x1xf32>
    %127 = vector.broadcast %126 : vector<8x1xf32> to vector<8x8xf32>
    %128 = arith.subf %124, %127 : vector<8x8xf32>
    %129 = math.exp %128 : vector<8x8xf32>
    %cst_38 = arith.constant dense<0.000000e+00> : vector<8xf32>
    %130 = vector.multi_reduction <add>, %129, %cst_38 [1] : vector<8x8xf32> to vector<8xf32>
    %131 = vector.shape_cast %130 : vector<8xf32> to vector<8x1xf32>
    %132 = tpu.reciprocal %131 {approx = true} : vector<8x1xf32> -> vector<8x1xf32>
    %133 = vector.broadcast %132 : vector<8x1xf32> to vector<8x8xf32>
    %134 = arith.mulf %129, %133 : vector<8x8xf32>
    %cst_39 = arith.constant dense<0.000000e+00> : vector<8x32xf32>
    %135 = tpu.matmul %134, %121, %cst_39 {dimension_numbers = #tpu.dot_dimension_numbers<[1], [0], [0], [1], [0, 0, 1, 1], [], []>} : vector<8x8xf32>, vector<8x32xf32>, vector<8x32xf32> -> vector<8x32xf32>
    %136 = arith.addf %118, %135 : vector<8x32xf32>
    %137 = vector.extract_strided_slice %30 {offsets = [8, 16], sizes = [8, 8], strides = [1, 1]} : vector<16x192xf32> to vector<8x8xf32>
    %138 = vector.extract_strided_slice %30 {offsets = [8, 48], sizes = [8, 8], strides = [1, 1]} : vector<16x192xf32> to vector<8x8xf32>
    %139 = vector.extract_strided_slice %30 {offsets = [8, 128], sizes = [8, 32], strides = [1, 1]} : vector<16x192xf32> to vector<8x32xf32>
    %cst_40 = arith.constant dense<0.000000e+00> : vector<8x8xf32>
    %140 = tpu.matmul %137, %138, %cst_40 {dimension_numbers = #tpu.dot_dimension_numbers<[1], [1], [0], [0], [0, 0, 1, 0], [], []>} : vector<8x8xf32>, vector<8x8xf32>, vector<8x8xf32> -> vector<8x8xf32>
    %cst_41 = arith.constant 0.353553385 : f32
    %141 = vector.broadcast %cst_41 : f32 to vector<8x8xf32>
    %142 = arith.mulf %140, %141 : vector<8x8xf32>
    %cst_42 = arith.constant dense<0xFF800000> : vector<8xf32>
    %143 = vector.multi_reduction <maximumf>, %142, %cst_42 [1] : vector<8x8xf32> to vector<8xf32>
    %144 = vector.shape_cast %143 : vector<8xf32> to vector<8x1xf32>
    %145 = vector.broadcast %144 : vector<8x1xf32> to vector<8x8xf32>
    %146 = arith.subf %142, %145 : vector<8x8xf32>
    %147 = math.exp %146 : vector<8x8xf32>
    %cst_43 = arith.constant dense<0.000000e+00> : vector<8xf32>
    %148 = vector.multi_reduction <add>, %147, %cst_43 [1] : vector<8x8xf32> to vector<8xf32>
    %149 = vector.shape_cast %148 : vector<8xf32> to vector<8x1xf32>
    %150 = tpu.reciprocal %149 {approx = true} : vector<8x1xf32> -> vector<8x1xf32>
    %151 = vector.broadcast %150 : vector<8x1xf32> to vector<8x8xf32>
    %152 = arith.mulf %147, %151 : vector<8x8xf32>
    %cst_44 = arith.constant dense<0.000000e+00> : vector<8x32xf32>
    %153 = tpu.matmul %152, %139, %cst_44 {dimension_numbers = #tpu.dot_dimension_numbers<[1], [0], [0], [1], [0, 0, 1, 1], [], []>} : vector<8x8xf32>, vector<8x32xf32>, vector<8x32xf32> -> vector<8x32xf32>
    %154 = arith.addf %136, %153 : vector<8x32xf32>
    %155 = vector.extract_strided_slice %30 {offsets = [8, 24], sizes = [8, 8], strides = [1, 1]} : vector<16x192xf32> to vector<8x8xf32>
    %156 = vector.extract_strided_slice %30 {offsets = [8, 56], sizes = [8, 8], strides = [1, 1]} : vector<16x192xf32> to vector<8x8xf32>
    %157 = vector.extract_strided_slice %30 {offsets = [8, 160], sizes = [8, 32], strides = [1, 1]} : vector<16x192xf32> to vector<8x32xf32>
    %cst_45 = arith.constant dense<0.000000e+00> : vector<8x8xf32>
    %158 = tpu.matmul %155, %156, %cst_45 {dimension_numbers = #tpu.dot_dimension_numbers<[1], [1], [0], [0], [0, 0, 1, 0], [], []>} : vector<8x8xf32>, vector<8x8xf32>, vector<8x8xf32> -> vector<8x8xf32>
    %cst_46 = arith.constant 0.353553385 : f32
    %159 = vector.broadcast %cst_46 : f32 to vector<8x8xf32>
    %160 = arith.mulf %158, %159 : vector<8x8xf32>
    %cst_47 = arith.constant dense<0xFF800000> : vector<8xf32>
    %161 = vector.multi_reduction <maximumf>, %160, %cst_47 [1] : vector<8x8xf32> to vector<8xf32>
    %162 = vector.shape_cast %161 : vector<8xf32> to vector<8x1xf32>
    %163 = vector.broadcast %162 : vector<8x1xf32> to vector<8x8xf32>
    %164 = arith.subf %160, %163 : vector<8x8xf32>
    %165 = math.exp %164 : vector<8x8xf32>
    %cst_48 = arith.constant dense<0.000000e+00> : vector<8xf32>
    %166 = vector.multi_reduction <add>, %165, %cst_48 [1] : vector<8x8xf32> to vector<8xf32>
    %167 = vector.shape_cast %166 : vector<8xf32> to vector<8x1xf32>
    %168 = tpu.reciprocal %167 {approx = true} : vector<8x1xf32> -> vector<8x1xf32>
    %169 = vector.broadcast %168 : vector<8x1xf32> to vector<8x8xf32>
    %170 = arith.mulf %165, %169 : vector<8x8xf32>
    %cst_49 = arith.constant dense<0.000000e+00> : vector<8x32xf32>
    %171 = tpu.matmul %170, %157, %cst_49 {dimension_numbers = #tpu.dot_dimension_numbers<[1], [0], [0], [1], [0, 0, 1, 1], [], []>} : vector<8x8xf32>, vector<8x32xf32>, vector<8x32xf32> -> vector<8x32xf32>
    %172 = arith.addf %154, %171 : vector<8x32xf32>
    %173 = tpu.concatenate %101, %172 in 0 : vector<8x32xf32>, vector<8x32xf32> -> vector<16x32xf32>
    %174 = vector.broadcast %7 : vector<1x32xf32> to vector<16x32xf32>
    %175 = arith.addf %173, %174 : vector<16x32xf32>
    %176 = arith.addf %0, %175 : vector<16x32xf32>
    %cst_50 = arith.constant dense<0.000000e+00> : vector<16xf32>
    %177 = vector.multi_reduction <add>, %176, %cst_50 [1] : vector<16x32xf32> to vector<16xf32>
    %178 = vector.shape_cast %177 : vector<16xf32> to vector<16x1xf32>
    %cst_51 = arith.constant 3.200000e+01 : f32
    %179 = vector.broadcast %cst_51 : f32 to vector<16x1xf32>
    %180 = arith.divf %178, %179 : vector<16x1xf32>
    %181 = vector.broadcast %180 : vector<16x1xf32> to vector<16x32xf32>
    %182 = arith.subf %176, %181 : vector<16x32xf32>
    %183 = arith.mulf %182, %182 : vector<16x32xf32>
    %cst_52 = arith.constant dense<0.000000e+00> : vector<16xf32>
    %184 = vector.multi_reduction <add>, %183, %cst_52 [1] : vector<16x32xf32> to vector<16xf32>
    %185 = vector.shape_cast %184 : vector<16xf32> to vector<16x1xf32>
    %cst_53 = arith.constant 3.200000e+01 : f32
    %186 = vector.broadcast %cst_53 : f32 to vector<16x1xf32>
    %187 = arith.divf %185, %186 : vector<16x1xf32>
    %188 = vector.broadcast %180 : vector<16x1xf32> to vector<16x32xf32>
    %189 = arith.subf %176, %188 : vector<16x32xf32>
    %cst_54 = arith.constant 9.99999974E-6 : f32
    %190 = vector.broadcast %cst_54 : f32 to vector<16x1xf32>
    %191 = arith.addf %187, %190 : vector<16x1xf32>
    %192 = math.rsqrt %191 : vector<16x1xf32>
    %193 = vector.broadcast %192 : vector<16x1xf32> to vector<16x32xf32>
    %194 = arith.mulf %189, %193 : vector<16x32xf32>
    %cst_55 = arith.constant dense<0.000000e+00> : vector<16x64xf32>
    %195 = tpu.matmul %194, %4, %cst_55 {dimension_numbers = #tpu.dot_dimension_numbers<[1], [0], [0], [1], [0, 0, 1, 1], [], []>} : vector<16x32xf32>, vector<32x64xf32>, vector<16x64xf32> -> vector<16x64xf32>
    %196 = vector.broadcast %8 : vector<1x64xf32> to vector<16x64xf32>
    %197 = arith.addf %195, %196 : vector<16x64xf32>
    %cst_56 = arith.constant 0.000000e+00 : f32
    %198 = vector.broadcast %cst_56 : f32 to vector<16x64xf32>
    %199 = arith.maximumf %197, %198 : vector<16x64xf32>
    %cst_57 = arith.constant dense<0.000000e+00> : vector<16x32xf32>
    %200 = tpu.matmul %199, %5, %cst_57 {dimension_numbers = #tpu.dot_dimension_numbers<[1], [0], [0], [1], [0, 0, 1, 1], [], []>} : vector<16x64xf32>, vector<64x32xf32>, vector<16x32xf32> -> vector<16x32xf32>
    %201 = vector.broadcast %9 : vector<1x32xf32> to vector<16x32xf32>
    %202 = arith.addf %200, %201 : vector<16x32xf32>
    %203 = arith.addf %176, %202 : vector<16x32xf32>
    %c0_58 = arith.constant 0 : index
    %c0_59 = arith.constant 0 : index
    %204 = vector.load %arg3[%c0_58, %c0_59] : memref<16x32xf32, #tpu.memory_space<vmem>>, vector<16x32xf32>
    tpu.vector_store %arg3[%c0_58, %c0_59], %203 {strides = array<i32>} : memref<16x32xf32, #tpu.memory_space<vmem>>, vector<16x32xf32>,
    return
  }
}

</mosaic_0001>

<bundles_post_ra>
// kernel: transformer_encoder_layer.1
= control target key start
LH: loop header
LB: loop body
LE: loop exit
PB: predicated region body
PF: predicated region fallthrough
CT: control target
= control target key end

     0   :  { %vm39_vm0 = vcmask 261120   ;;  %s2332_s0 = inlined_call_operand.vmem [shape: f32[16,32], index: 0, kind: input, shape index: {}]   ;;  %s2333_s1 = inlined_call_operand.vmem [shape: f32[128,192], index: 1, kind: input, shape index: {}]   ;;  %s2334_s2 = inlined_call_operand.vmem [shape: f32[8,192], index: 2, kind: input, shape index: {}]   ;;  %s2335_s3 = inlined_call_operand.hbm [shape: f32[16,32], index: 3, kind: output, shape index: {}]  }
   0x1   :  { %v2051_v0 = vld [vmem:[%s2332_s0] sm:$0xff] }
   0x2   :  { %8 = vsyncpa [#allocation3], 0  ;;  %v40_v1 = vsel %vm39_vm0, %v2051_v0, 0.0  ;;  %v2058_v2 = vld [vmem:[%s2332_s0 + $0x8] sm:$0xff]  ;;  %v20_v10 = vld [vmem:[%s2333_s1 + $0x18] sm:$0xff]  ;;  %v2014_v16 = vmov 0.0   ;;  %v67_v37 = vlaneseq }
   0x3   :  { %41 = vadd.xlane.f32.xlu0 %v40_v1  ;;  %v43_v3 = vsel %vm39_vm0, %v2058_v2, 0.0  ;;  %v18_v9 = vld [vmem:[%s2333_s1 + $0x8] sm:$0xff]  ;;  %v17_v11 = vld [vmem:[%s2333_s1] sm:$0xff]  ;;  %v19_v13 = vld [vmem:[%s2333_s1 + $0x10] sm:$0xff]  ;;  %145 = vmatprep.mubr.f32.mxu0 %v2014_v16  ;;  %vm2015_vm1 = vmmov 0   ;;  %s2016_s6 = smov 88  }
   0x4   :  { %44 = vadd.xlane.f32.xlu1 %v43_v3  ;;  %v1900_v12 = vpack.c.bf16 %v20_v10, %v18_v9  ;;  %v22_v14 = vld [vmem:[%s2333_s1 + $0x28] sm:$0xff]  ;;  %v24_v15 = vld [vmem:[%s2333_s1 + $0x38] sm:$0xff]  ;;  %151 = vmatprep.mubr.f32.mxu1 %v2014_v16  ;;  %v1902_v17 = vpack.c.bf16 %v19_v13, %v17_v11  ;;  %v21_v19 = vld [vmem:[%s2333_s1 + $0x20] sm:$0xff]  ;;  %v2096_v38 = vshrl.u32 %v67_v37, 7  ;;  %s2017_s7 = smov 96   ;;  %s2018_s8 = smov 120  }
   0x5   :  { %v1904_v18 = vpack.c.bf16 %v24_v15, %v22_v14  ;;  %v23_v20 = vld [vmem:[%s2333_s1 + $0x30] sm:$0xff]  ;;  %v2106_v40 = vld [vmem:[%s2334_s2] sm:$0xff]  ;;  %v38_v45 = vld [vmem:[%s2334_s2 + $0x8] sm:$0xff]  ;;  %vm161_vm2 = vcmask 64512   ;;  %s2019_s2 = smov 80   ;;  %s2020_s11 = smov 112  }
   0x6   :  { %1901 = vmatprep.subr.bf16.mxu0 %v1900_v12  ;;  %1932 = vmatprep.subr.bf16.mxu1 %v1900_v12  ;;  %v1906_v22 = vpack.c.bf16 %v23_v20, %v21_v19  ;;  %v69_v39 = vsub.s32 0, %v2096_v38  ;;  %s2021_s12 = smov 104   ;;  %s2022_s13 = smov 32   ;;  %vm1610_vm3 = vcmask 523264  }
   0x7   :  { %1903 = vmatpush1.bf16.msra.mxu0 %v1902_v17  ;;  %1934 = vmatpush1.bf16.msra.mxu1 %v1902_v17  ;;  %s2023_s14 = smov 72   ;;  %s2024_s15 = smov 64  }
   0x8   :  { %1905 = vmatprep.subr.bf16.mxu0 %v1904_v18  ;;  %1933 = vmatprep.subr.bf16.mxu1 %v1904_v18  ;;  %v70_v41 = vrot.slane %v2106_v40, %v69_v39  ;;  %v2122_v46 = vrot.slane %v38_v45, %v69_v39 }
   0xb   :  { %1907 = vmatpush1.bf16.msra.mxu0 %v1906_v22  ;;  %1935 = vmatpush1.bf16.msra.mxu1 %v1906_v22 }
   0xc   :  { %1790 = vmatprep.subr.mxu1 %v2014_v16  ;;  %1805 = vmatprep.subr.mxu0 %v2014_v16 }
  0x90   :  { %v42_v4 = vpop.xlane.xlu0 %41 }
  0x91   :  { %v47_v5 = vmul.f32 0.03125, %v42_v4  ;;  %v45_v21 = vpop.xlane.xlu1 %44 }
  0x92   :  { %v48_v23 = vmul.f32 0.03125, %v45_v21 }
  0x93   :  { %v49_v6 = vsub.f32 %v2051_v0, %v47_v5 }
  0x94   :  { %v50_v24 = vsub.f32 %v2058_v2, %v48_v23 }
  0x95   :  { %v51_v7 = vmul.f32 %v49_v6, %v49_v6 }
  0x96   :  { %v52_v25 = vmul.f32 %v50_v24, %v50_v24 }
  0x97   :  { %v53_v8 = vsel %vm39_vm0, %v51_v7, 0.0 }
  0x98   :  { %54 = vadd.xlane.f32.xlu0 %v53_v8  ;;  %v56_v26 = vsel %vm39_vm0, %v52_v25, 0.0 }
  0x99   :  { %57 = vadd.xlane.f32.xlu1 %v56_v26 }
 0x125   :  { %v55_v27 = vpop.xlane.xlu0 %54 }
 0x126   :  { %v59_v28 = vmul.f32 0.03125, %v55_v27  ;;  %v58_v32 = vpop.xlane.xlu1 %57 }
 0x127   :  { %v60_v33 = vmul.f32 0.03125, %v58_v32 }
 0x128   :  { %v61_v29 = vadd.f32 64.0, %v59_v28 }
 0x129   :  { %v62_v34 = vadd.f32 64.0, %v60_v33 }
 0x12a   :  { %1950 = vrsqrt.f32 %v61_v29 }
 0x12b   :  { %1952 = vrsqrt.f32 %v62_v34 }
 0x134   :  { %v1951_v30 = vpop.eup %1950 }
 0x135   :  { %v65_v31 = vmul.f32 %v1951_v30, %v49_v6  ;;  %v1953_v35 = vpop.eup %1952 }
 0x136   :  { %v66_v36 = vmul.f32 %v1953_v35, %v50_v24 }
 0x137   :  { %1712 = vmatmul.mubr.msk.f32.vlgmr.msra.gmra.mrb[0].mxu0 %vm39_vm0, %v65_v31 }
 0x138   :  { %1713 = vmatmul.mubr.msk.f32.vlgmr.msra.gmra.mrb[0].mxu1 %vm39_vm0, %v66_v36  ;;  %1807 = vmatprep.mubr.msk.f32.mxu0 %vm2015_vm1, %v2014_v16 }
 0x139   :  { %1792 = vmatprep.mubr.msk.f32.mxu1 %vm2015_vm1, %v2014_v16 }
 0x20a   :  { %v147_v42 = vpop.f32.mrb[0].mxu0 }
 0x20b   :  { %v2109_v43 = vadd.f32 %v147_v42, %v70_v41  ;;  %v2111_v44 = vpop.f32.mrb[1].mxu0  ;;  %v153_v47 = vpop.f32.mrb[0].mxu1 }
 0x20c   :  { %v2124_v48 = vadd.f32 %v153_v47, %v70_v41  ;;  %v155_v49 = vpop.f32.mrb[1].mxu1  ;;  %v150_v29 = vadd.f32 %v2111_v44, %v2122_v46 }
 0x20d   :  { %250 = vrot.lane.b32.xlu1 %v2109_v43, %s2016_s6  ;;  %159 = vrot.lane.b32.xlu0 %v2109_v43, %s2017_s7  ;;  %v2127_v50 = vadd.f32 %v155_v49, %v2122_v46 }
 0x211   :  { %248 = vrot.lane.b32.xlu1 %v2109_v43, %s2018_s8 }
 0x27f   :  { %v160_v51 = vpop.permute.xlu0 %159  ;;  %v251_v52 = vpop.permute.xlu1 %250 }
 0x280   :  { %1791 = vmatpush3.xpose.msk.msra.mxu1 %vm161_vm2, %v160_v51 }
 0x281   :  { %1795 = vmatprep.subr.mxu1 %v2014_v16 }
 0x283   :  { %1793 = vmatmul.mubr.msk.f32.vlgmr.msra.gmra.mrb[2].mxu1 %vm161_vm2, %v2109_v43  ;;  %v249_v53 = vpop.permute.xlu1 %248 }
 0x284   :  { %1796 = vmatpush3.xpose.msk.msra.mxu1 %vm161_vm2, %v251_v52  ;;  %1797 = vmatprep.mubr.msk.f32.mxu1 %vm2015_vm1, %v2014_v16 }
 0x285   :  { %1800 = vmatprep.subr.mxu1 %v2014_v16 }
 0x287   :  { %1798 = vmatmul.mubr.msk.f32.vlgmr.msra.gmra.mrb[4].mxu1 %vm161_vm2, %v249_v53 }
 0x288   :  { %1802 = vmatprep.mubr.msk.f32.mxu1 %vm2015_vm1, %v2014_v16 }
 0x356   :  { %v232_v54 = vpop.f32.mrb[2].mxu1 }
 0x357   :  { %v1794_v55 = vpop.f32.mrb[3].mxu1  ;;  %v236_v3 = vmul.f32 0.35355338, %v232_v54 }
 0x359   :  { %v237_v4 = vsel %vm161_vm2, %v236_v3, -inf }
 0x35a   :  { %v322_v56 = vpop.f32.mrb[4].mxu1 }
 0x35b   :  { %v326_v57 = vmul.f32 0.35355338, %v322_v56  ;;  %v1799_v58 = vpop.f32.mrb[5].mxu1 }
 0x35d   :  { %v327_v59 = vsel %vm161_vm2, %v326_v57, -inf }
 0x35e   :  { %328 = vmax.xlane.f32.xlu1 %v327_v59 }
 0x36f   :  { %492 = vrot.lane.b32.xlu1 %v2109_v43, %s2019_s2 }
 0x373   :  { %490 = vrot.lane.b32.xlu1 %v2109_v43, %s2020_s11 }
 0x377   :  { %654 = vrot.lane.b32.xlu1 %v2109_v43, %s2021_s12 }
 0x3eb   :  { %v329_v60 = vpop.xlane.xlu1 %328 }
 0x3ec   :  { %v330_v61 = vsub.f32 %v326_v57, %v329_v60 }
 0x3ee   :  { %v331_v62 = vmul.f32 1.442695, %v330_v61 }
 0x3ef   :  { %v493_v7 = vpop.permute.xlu1 %492 }
 0x3f0   :  { %1954 = vpow2.f32 %v331_v62 }
 0x3f3   :  { %v491_v10 = vpop.permute.xlu1 %490 }
 0x3f7   :  { %v655_v12 = vpop.permute.xlu1 %654 }
 0x3fa   :  { %v1955_v63 = vpop.eup %1954 }
 0x3fb   :  { %v333_v1 = vsel %vm161_vm2, %v1955_v63, 0.0 }
 0x3fc   :  { %334 = vadd.xlane.f32.xlu0 %v333_v1 }
 0x412   :  { %338 = vrot.lane.b32.xlu0 %v2109_v43, %s2022_s13 }
 0x416   :  { %656 = vrot.lane.b32.xlu0 %v2109_v43, %s2023_s14 }
 0x435   :  { %238 = vmax.xlane.f32.xlu0 %v237_v4 }
 0x489   :  { %v335_v5 = vpop.xlane.xlu0 %334 }
 0x48a   :  { %1956 = vrcp.f32 %v335_v5 }
 0x48d   :  { %v339_v6 = vpop.permute.xlu0 %338 }
 0x48e   :  { %1801 = vmatpush3.msra.mxu1 %v339_v6 }
 0x48f   :  { %1810 = vmatprep.subr.mxu1 %v2014_v16 }
 0x491   :  { %v657_v11 = vpop.permute.xlu0 %656 }
 0x494   :  { %v1957_v8 = vpop.eup %1956 }
 0x495   :  { %v337_v9 = vmul.f32 %v1957_v8, %v1955_v63 }
 0x497   :  { %1803 = vmatmul.mubr.msk.f32.vlgmr.msra.gmra.mrb[6].mxu1 %vm161_vm2, %v337_v9 }
 0x498   :  { %1811 = vmatpush3.xpose.msk.msra.mxu1 %vm161_vm2, %v493_v7  ;;  %1812 = vmatprep.mubr.msk.f32.mxu1 %vm2015_vm1, %v2014_v16 }
 0x499   :  { %1820 = vmatprep.subr.mxu1 %v2014_v16 }
 0x49b   :  { %1813 = vmatmul.mubr.msk.f32.vlgmr.msra.gmra.mrb[8].mxu1 %vm161_vm2, %v491_v10 }
 0x49c   :  { %1821 = vmatpush3.xpose.msk.msra.mxu1 %vm161_vm2, %v657_v11  ;;  %1822 = vmatprep.mubr.msk.f32.mxu1 %vm2015_vm1, %v2014_v16 }
 0x49d   :  { %1830 = vmatprep.subr.mxu1 %v2014_v16 }
 0x49f   :  { %1823 = vmatmul.mubr.msk.f32.vlgmr.msra.gmra.mrb[10].mxu1 %vm161_vm2, %v655_v12 }
 0x4a0   :  { %1832 = vmatprep.mubr.msk.f32.mxu1 %vm2015_vm1, %v2014_v16 }
 0x4c2   :  { %v239_v13 = vpop.xlane.xlu0 %238 }
 0x4c3   :  { %v240_v14 = vsub.f32 %v236_v3, %v239_v13 }
 0x4c5   :  { %v241_v15 = vmul.f32 1.442695, %v240_v14 }
 0x4c7   :  { %1958 = vpow2.f32 %v241_v15 }
 0x4d1   :  { %v1959_v27 = vpop.eup %1958 }
 0x4d2   :  { %v243_v28 = vsel %vm161_vm2, %v1959_v27, 0.0 }
 0x56a   :  { %v2167_v17 = vpop.f32.mrb[6].mxu1 }
 0x56b   :  { %v1804_v18 = vpop.f32.mrb[7].mxu1 }
 0x56e   :  { %v564_v19 = vpop.f32.mrb[8].mxu1 }
 0x56f   :  { %v568_v20 = vmul.f32 0.35355338, %v564_v19  ;;  %v1814_v21 = vpop.f32.mrb[9].mxu1 }
 0x571   :  { %v569_v22 = vsel %vm161_vm2, %v568_v20, -inf }
 0x572   :  { %570 = vmax.xlane.f32.xlu1 %v569_v22  ;;  %v728_v23 = vpop.f32.mrb[10].mxu1 }
 0x573   :  { %v732_v24 = vmul.f32 0.35355338, %v728_v23  ;;  %v1824_v25 = vpop.f32.mrb[11].mxu1 }
 0x575   :  { %v733_v26 = vsel %vm161_vm2, %v732_v24, -inf }
 0x576   :  { %734 = vmax.xlane.f32.xlu0 %v733_v26 }
 0x57a   :  { %244 = vadd.xlane.f32.xlu0 %v243_v28 }
 0x583   :  { %745 = vrot.lane.b32.xlu1 %v150_v29, %s2017_s7 }
 0x587   :  { %913 = vrot.lane.b32.xlu1 %v2124_v48, %s2016_s6 }
 0x5ff   :  { %v571_v30 = vpop.xlane.xlu1 %570 }
 0x600   :  { %v572_v31 = vsub.f32 %v568_v20, %v571_v30 }
 0x602   :  { %v573_v32 = vmul.f32 1.442695, %v572_v31 }
 0x603   :  { %v735_v33 = vpop.xlane.xlu0 %734  ;;  %v746_v44 = vpop.permute.xlu1 %745 }
 0x604   :  { %1960 = vpow2.f32 %v573_v32  ;;  %v736_v34 = vsub.f32 %v732_v24, %v735_v33 }
 0x606   :  { %v737_v35 = vmul.f32 1.442695, %v736_v34 }
 0x607   :  { %v245_v42 = vpop.xlane.xlu0 %244  ;;  %v914_v45 = vpop.permute.xlu1 %913 }
 0x608   :  { %1962 = vpow2.f32 %v737_v35 }
 0x609   :  { %1964 = vrcp.f32 %v245_v42 }
 0x60e   :  { %v1961_v36 = vpop.eup %1960 }
 0x60f   :  { %v575_v37 = vsel %vm161_vm2, %v1961_v36, 0.0 }
 0x610   :  { %576 = vadd.xlane.f32.xlu0 %v575_v37 }
 0x612   :  { %v1963_v39 = vpop.eup %1962 }
 0x613   :  { %v739_v41 = vsel %vm161_vm2, %v1963_v39, 0.0  ;;  %v1965_v47 = vpop.eup %1964 }
 0x614   :  { %740 = vadd.xlane.f32.xlu1 %v739_v41  ;;  %v247_v49 = vmul.f32 %v1965_v47, %v1959_v27 }
 0x625   :  { %911 = vrot.lane.b32.xlu1 %v2124_v48, %s2018_s8 }
 0x626   :  { %414 = vrot.lane.b32.xlu0 %v2109_v43, %s2024_s15 }
 0x629   :  { %1001 = vrot.lane.b32.xlu1 %v2124_v48, %s2022_s13 }
 0x62d   :  { %1153 = vrot.lane.b32.xlu1 %v2124_v48, %s2020_s11 }
 0x69d   :  { %v577_v46 = vpop.xlane.xlu0 %576 }
 0x69e   :  { %1966 = vrcp.f32 %v577_v46 }
 0x6a1   :  { %v741_v51 = vpop.xlane.xlu1 %740  ;;  %v415_v52 = vpop.permute.xlu0 %414 }
 0x6a2   :  { %1968 = vrcp.f32 %v741_v51  ;;  %1806 = vmatpush3.msra.mxu0 %v415_v52 }
 0x6a3   :  { %1808 = vmatmul.mubr.msk.f32.vlgmr.msra.gmra.mrb[2].mxu0 %vm161_vm2, %v247_v49  ;;  %1815 = vmatprep.subr.mxu0 %v2014_v16 }
 0x6a4   :  { %1816 = vmatpush3.msra.mxu0 %v150_v29  ;;  %1817 = vmatprep.mubr.msk.f32.mxu0 %vm2015_vm1, %v2014_v16 }
 0x6a5   :  { %1825 = vmatprep.subr.mxu0 %v2014_v16  ;;  %v912_v56 = vpop.permute.xlu1 %911 }
 0x6a8   :  { %v1967_v43 = vpop.eup %1966 }
 0x6a9   :  { %v579_v53 = vmul.f32 %v1967_v43, %v1961_v36  ;;  %v1002_v12 = vpop.permute.xlu1 %1001 }
 0x6ab   :  { %1818 = vmatmul.mubr.msk.f32.vlgmr.msra.gmra.mrb[4].mxu0 %vm161_vm2, %v579_v53 }
 0x6ac   :  { %v1969_v54 = vpop.eup %1968  ;;  %1826 = vmatpush3.msra.mxu0 %v746_v44  ;;  %1827 = vmatprep.mubr.msk.f32.mxu0 %vm2015_vm1, %v2014_v16 }
 0x6ad   :  { %v743_v55 = vmul.f32 %v1969_v54, %v1963_v39  ;;  %1835 = vmatprep.subr.mxu0 %v2014_v16  ;;  %v1154_v15 = vpop.permute.xlu1 %1153 }
 0x6af   :  { %1828 = vmatmul.mubr.msk.f32.vlgmr.msra.gmra.mrb[6].mxu0 %vm161_vm2, %v743_v55 }
 0x6b0   :  { %1837 = vmatprep.mubr.msk.f32.mxu0 %vm2015_vm1, %v2014_v16 }
 0x6b3   :  { %1836 = vmatpush3.xpose.msk.msra.mxu0 %vm161_vm2, %v914_v45 }
 0x6b4   :  { %1845 = vmatprep.subr.mxu0 %v2014_v16 }
 0x6b6   :  { %1838 = vmatmul.mubr.msk.f32.vlgmr.msra.gmra.mrb[8].mxu0 %vm161_vm2, %v912_v56  ;;  %v1487_v56 = vsub.s32 1, %v2096_v38 }
 0x6b7   :  { %1847 = vmatprep.mubr.msk.f32.mxu0 %vm2015_vm1, %v2014_v16 }
 0x776   :  { %v486_v57 = vpop.f32.mrb[2].mxu0 }
 0x777   :  { %v487_v58 = vadd.f32 %v486_v57, %v2167_v17  ;;  %v1809_v59 = vpop.f32.mrb[3].mxu0  ;;  %v1488_v57 = vrot.slane %v2106_v40, %v1487_v56 }
 0x77e   :  { %v649_v60 = vpop.f32.mrb[4].mxu0 }
 0x77f   :  { %v653_v61 = vadd.f32 %v649_v60, %v487_v58  ;;  %v1819_v62 = vpop.f32.mrb[5].mxu0 }
 0x782   :  { %v817_v63 = vpop.f32.mrb[6].mxu0 }
 0x783   :  { %v2205_v1 = vadd.f32 %v817_v63, %v653_v61  ;;  %v1829_v3 = vpop.f32.mrb[7].mxu0 }
 0x785   :  { %v1489_v58 = vadd.f32 %v1488_v57, %v2205_v1 }
 0x787   :  { %v2250_v59 = vadd.f32 %v1489_v58, %v2051_v0  ;;  %v36_v58 = vld [vmem:[%s2333_s1 + $0xf0] sm:$0xff] }
 0x789   :  { %v985_v4 = vpop.f32.mrb[8].mxu0  ;;  %v1493_v60 = vsel %vm39_vm0, %v2250_v59, 0.0 }
 0x78a   :  { %v989_v5 = vmul.f32 0.35355338, %v985_v4  ;;  %v1839_v6 = vpop.f32.mrb[9].mxu0 }
 0x78c   :  { %v990_v7 = vsel %vm161_vm2, %v989_v5, -inf }
 0x78d   :  { %991 = vmax.xlane.f32.xlu0 %v990_v7 }
 0x7a3   :  { %823 = vrot.lane.b32.xlu0 %v2124_v48, %s2017_s7 }
 0x7a7   :  { %1155 = vrot.lane.b32.xlu0 %v2124_v48, %s2019_s2 }
 0x7ab   :  { %1319 = vrot.lane.b32.xlu0 %v2124_v48, %s2023_s14 }
 0x81a   :  { %v992_v8 = vpop.xlane.xlu0 %991 }
 0x81b   :  { %v993_v9 = vsub.f32 %v989_v5, %v992_v8 }
 0x81d   :  { %v994_v10 = vmul.f32 1.442695, %v993_v9 }
 0x81e   :  { %v824_v11 = vpop.permute.xlu0 %823 }
 0x81f   :  { %1970 = vpow2.f32 %v994_v10  ;;  %1831 = vmatpush3.xpose.msk.msra.mxu1 %vm161_vm2, %v824_v11 }
 0x820   :  { %1840 = vmatprep.subr.mxu1 %v2014_v16 }
 0x822   :  { %1833 = vmatmul.mubr.msk.f32.vlgmr.msra.gmra.mrb[12].mxu1 %vm161_vm2, %v2124_v48  ;;  %v1156_v19 = vpop.permute.xlu0 %1155 }
 0x823   :  { %1841 = vmatpush3.msra.mxu1 %v1002_v12  ;;  %1842 = vmatprep.mubr.msk.f32.mxu1 %vm2015_vm1, %v2014_v16 }
 0x824   :  { %1850 = vmatprep.subr.mxu1 %v2014_v16 }
 0x826   :  { %v1320_v21 = vpop.permute.xlu0 %1319 }
 0x829   :  { %v1971_v13 = vpop.eup %1970 }
 0x82a   :  { %v996_v14 = vsel %vm161_vm2, %v1971_v13, 0.0 }
 0x82b   :  { %997 = vadd.xlane.f32.xlu1 %v996_v14 }
 0x83c   :  { %1317 = vrot.lane.b32.xlu1 %v2124_v48, %s2021_s12 }
 0x8b8   :  { %v998_v17 = vpop.xlane.xlu1 %997 }
 0x8b9   :  { %1972 = vrcp.f32 %v998_v17 }
 0x8bc   :  { %v1318_v22 = vpop.permute.xlu1 %1317 }
 0x8c3   :  { %v1973_v18 = vpop.eup %1972 }
 0x8c4   :  { %v1000_v20 = vmul.f32 %v1973_v18, %v1971_v13 }
 0x8c6   :  { %1843 = vmatmul.mubr.msk.f32.vlgmr.msra.gmra.mrb[14].mxu1 %vm161_vm2, %v1000_v20 }
 0x8c7   :  { %1851 = vmatpush3.xpose.msk.msra.mxu1 %vm161_vm2, %v1156_v19  ;;  %1852 = vmatprep.mubr.msk.f32.mxu1 %vm2015_vm1, %v2014_v16 }
 0x8c8   :  { %1860 = vmatprep.subr.mxu1 %v2014_v16 }
 0x8ca   :  { %1853 = vmatmul.mubr.msk.f32.vlgmr.msra.gmra.mrb[16].mxu1 %vm161_vm2, %v1154_v15 }
 0x8cb   :  { %1861 = vmatpush3.xpose.msk.msra.mxu1 %vm161_vm2, %v1320_v21  ;;  %1862 = vmatprep.mubr.msk.f32.mxu1 %vm2015_vm1, %v2014_v16 }
 0x8ce   :  { %1863 = vmatmul.mubr.msk.f32.vlgmr.msra.gmra.mrb[18].mxu1 %vm161_vm2, %v1318_v22 }
 0x8f5   :  { %v895_v23 = vpop.f32.mrb[12].mxu1 }
 0x8f6   :  { %v899_v24 = vmul.f32 0.35355338, %v895_v23  ;;  %v1834_v25 = vpop.f32.mrb[13].mxu1 }
 0x8f8   :  { %v900_v26 = vsel %vm161_vm2, %v899_v24, -inf }
 0x8f9   :  { %901 = vmax.xlane.f32.xlu0 %v900_v26 }
 0x986   :  { %v902_v27 = vpop.xlane.xlu0 %901 }
 0x987   :  { %v903_v28 = vsub.f32 %v899_v24, %v902_v27 }
 0x989   :  { %v904_v29 = vmul.f32 1.442695, %v903_v28 }
 0x98b   :  { %1974 = vpow2.f32 %v904_v29 }
 0x995   :  { %v1975_v42 = vpop.eup %1974 }
 0x996   :  { %v906_v44 = vsel %vm161_vm2, %v1975_v42, 0.0 }
 0x999   :  { %v2235_v30 = vpop.f32.mrb[14].mxu1 }
 0x99a   :  { %v1844_v31 = vpop.f32.mrb[15].mxu1 }
 0x99d   :  { %v1227_v32 = vpop.f32.mrb[16].mxu1 }
 0x99e   :  { %v1231_v33 = vmul.f32 0.35355338, %v1227_v32  ;;  %v1854_v34 = vpop.f32.mrb[17].mxu1 }
 0x99f   :  { %v26_v34 = vld [vmem:[%s2333_s1 + $0x50] sm:$0xff] }
 0x9a0   :  { %v1232_v35 = vsel %vm161_vm2, %v1231_v33, -inf }
 0x9a1   :  { %1233 = vmax.xlane.f32.xlu1 %v1232_v35  ;;  %v1391_v36 = vpop.f32.mrb[18].mxu1 }
 0x9a2   :  { %v1395_v37 = vmul.f32 0.35355338, %v1391_v36  ;;  %v1864_v39 = vpop.f32.mrb[19].mxu1  ;;  %v27_v36 = vld [vmem:[%s2333_s1 + $0x60] sm:$0xff] }
 0x9a4   :  { %v1396_v41 = vsel %vm161_vm2, %v1395_v37, -inf }
 0x9a5   :  { %1397 = vmax.xlane.f32.xlu0 %v1396_v41  ;;  %v29_v41 = vld [vmem:[%s2333_s1 + $0x80] sm:$0xff] }
 0x9a9   :  { %907 = vadd.xlane.f32.xlu0 %v906_v44  ;;  %v31_v44 = vld [vmem:[%s2333_s1 + $0xa0] sm:$0xff] }
 0xa2e   :  { %v1234_v45 = vpop.xlane.xlu1 %1233 }
 0xa2f   :  { %v1235_v46 = vsub.f32 %v1231_v33, %v1234_v45  ;;  %v25_v33 = vld [vmem:[%s2333_s1 + $0x40] sm:$0xff] }
 0xa30   :  { %v1908_v35 = vpack.c.bf16 %v26_v34, %v25_v33 }
 0xa31   :  { %v1236_v47 = vmul.f32 1.442695, %v1235_v46  ;;  %v32_v46 = vld [vmem:[%s2333_s1 + $0xb0] sm:$0xff] }
 0xa32   :  { %v1398_v49 = vpop.xlane.xlu0 %1397  ;;  %1909 = vmatprep.subr.bf16.mxu1 %v1908_v35 }
 0xa33   :  { %1976 = vpow2.f32 %v1236_v47  ;;  %v1399_v51 = vsub.f32 %v1395_v37, %v1398_v49  ;;  %1911 = vmatpush3.bf16.msra.mxu1 %v1908_v35  ;;  %v28_v37 = vld [vmem:[%s2333_s1 + $0x70] sm:$0xff]  ;;  %v1920_v47 = vpack.c.bf16 %v32_v46, %v31_v44  ;;  %v33_v49 = vld [vmem:[%s2333_s1 + $0xc0] sm:$0xff] }
 0xa34   :  { %v1912_v39 = vpack.c.bf16 %v28_v37, %v27_v36 }
 0xa35   :  { %v1400_v52 = vmul.f32 1.442695, %v1399_v51  ;;  %v34_v51 = vld [vmem:[%s2333_s1 + $0xd0] sm:$0xff] }
 0xa36   :  { %v908_v61 = vpop.xlane.xlu0 %907  ;;  %1913 = vmatprep.subr.bf16.mxu1 %v1912_v39 }
 0xa37   :  { %1978 = vpow2.f32 %v1400_v52  ;;  %1915 = vmatpush3.bf16.msra.mxu1 %v1912_v39  ;;  %v1924_v52 = vpack.c.bf16 %v34_v51, %v33_v49 }
 0xa38   :  { %1980 = vrcp.f32 %v908_v61  ;;  %v1521_v61 = vsub.s32 2, %v2096_v38 }
 0xa3d   :  { %v1977_v43 = vpop.eup %1976 }
 0xa3e   :  { %v1238_v53 = vsel %vm161_vm2, %v1977_v43, 0.0 }
 0xa3f   :  { %1239 = vadd.xlane.f32.xlu0 %v1238_v53 }
 0xa41   :  { %v1979_v54 = vpop.eup %1978 }
 0xa42   :  { %v1402_v55 = vsel %vm161_vm2, %v1979_v54, 0.0  ;;  %v1981_v63 = vpop.eup %1980 }
 0xa43   :  { %1403 = vadd.xlane.f32.xlu1 %v1402_v55  ;;  %v910_v3 = vmul.f32 %v1981_v63, %v1975_v42  ;;  %v30_v42 = vld [vmem:[%s2333_s1 + $0x90] sm:$0xff] }
 0xa44   :  { %v1916_v45 = vpack.c.bf16 %v30_v42, %v29_v41 }
 0xa54   :  { %1408 = vrot.lane.b32.xlu1 %v2127_v50, %s2017_s7 }
 0xa55   :  { %1077 = vrot.lane.b32.xlu0 %v2124_v48, %s2024_s15 }
 0xa78   :  { %1494 = vadd.xlane.f32.xlu1 %v1493_v60 }
 0xacc   :  { %v1240_v62 = vpop.xlane.xlu0 %1239 }
 0xacd   :  { %1982 = vrcp.f32 %v1240_v62  ;;  %v1522_v62 = vrot.slane %v2106_v40, %v1521_v61 }
 0xad0   :  { %v1404_v48 = vpop.xlane.xlu1 %1403  ;;  %v1078_v4 = vpop.permute.xlu0 %1077 }
 0xad1   :  { %1984 = vrcp.f32 %v1404_v48  ;;  %1846 = vmatpush3.msra.mxu0 %v1078_v4 }
 0xad2   :  { %1848 = vmatmul.mubr.msk.f32.vlgmr.msra.gmra.mrb[10].mxu0 %vm161_vm2, %v910_v3  ;;  %1855 = vmatprep.subr.mxu0 %v2014_v16 }
 0xad3   :  { %1856 = vmatpush3.msra.mxu0 %v2127_v50  ;;  %1857 = vmatprep.mubr.msk.f32.mxu0 %vm2015_vm1, %v2014_v16 }
 0xad4   :  { %1865 = vmatprep.subr.mxu0 %v2014_v16  ;;  %v1409_v5 = vpop.permute.xlu1 %1408 }
 0xad7   :  { %v1983_v0 = vpop.eup %1982 }
 0xad8   :  { %v1242_v1 = vmul.f32 %v1983_v0, %v1977_v43 }
 0xada   :  { %1858 = vmatmul.mubr.msk.f32.vlgmr.msra.gmra.mrb[12].mxu0 %vm161_vm2, %v1242_v1 }
 0xadb   :  { %v1985_v6 = vpop.eup %1984  ;;  %1866 = vmatpush3.msra.mxu0 %v1409_v5  ;;  %1867 = vmatprep.mubr.msk.f32.mxu0 %vm2015_vm1, %v2014_v16  ;;  %v1608_v5 = vsub.s32 3, %v2096_v38 }
 0xadc   :  { %v1406_v7 = vmul.f32 %v1985_v6, %v1979_v54  ;;  %1917 = vmatprep.subr.bf16.mxu0 %v1916_v45 }
 0xadd   :  { %v1609_v6 = vrot.slane %v2106_v40, %v1608_v5 }
 0xade   :  { %1868 = vmatmul.mubr.msk.f32.vlgmr.msra.gmra.mrb[14].mxu0 %vm161_vm2, %v1406_v7 }
 0xadf   :  { %1919 = vmatpush3.bf16.msra.mxu0 %v1916_v45 }
 0xae0   :  { %1921 = vmatprep.subr.bf16.mxu0 %v1920_v47 }
 0xae3   :  { %1923 = vmatpush3.bf16.msra.mxu0 %v1920_v47 }
 0xae4   :  { %1925 = vmatprep.subr.bf16.mxu0 %v1924_v52 }
 0xae7   :  { %1927 = vmatpush3.bf16.msra.mxu0 %v1924_v52 }
 0xb05   :  { %v1495_v10 = vpop.xlane.xlu1 %1494 }
 0xb06   :  { %v1499_v14 = vmul.f32 0.03125, %v1495_v10 }
 0xb08   :  { %v1501_v19 = vsub.f32 %v2250_v59, %v1499_v14 }
 0xb0a   :  { %v1503_v22 = vmul.f32 %v1501_v19, %v1501_v19 }
 0xb0c   :  { %v1505_v23 = vsel %vm39_vm0, %v1503_v22, 0.0 }
 0xba5   :  { %v1149_v8 = vpop.f32.mrb[10].mxu0 }
 0xba6   :  { %v1150_v50 = vadd.f32 %v1149_v8, %v2235_v30  ;;  %v1849_v9 = vpop.f32.mrb[11].mxu0 }
 0xbad   :  { %v1312_v11 = vpop.f32.mrb[12].mxu0 }
 0xbae   :  { %v1316_v12 = vadd.f32 %v1312_v11, %v1150_v50  ;;  %v1859_v13 = vpop.f32.mrb[13].mxu0 }
 0xbb1   :  { %v1480_v15 = vpop.f32.mrb[14].mxu0 }
 0xbb2   :  { %v1484_v17 = vadd.f32 %v1480_v15, %v1316_v12  ;;  %v1869_v18 = vpop.f32.mrb[15].mxu0 }
 0xbb4   :  { %v1490_v20 = vadd.f32 %v1488_v57, %v1484_v17  ;;  %v35_v57 = vld [vmem:[%s2333_s1 + $0xe0] sm:$0xff]  ;;  %s2025_s1 = smov [#allocation2]  }
 0xbb5   :  { %v1928_v60 = vpack.c.bf16 %v36_v58, %v35_v57  ;;  %s1701_s11 = sshll.u32 %s2025_s1, 4  ;;  %s1702_s11 = int_to_ptr.vmem [resolvable:$true] %s1701_s11 }
 0xbb6   :  { %v2267_v16 = vadd.f32 %v1490_v20, %v2058_v2  ;;  %s1990_s12 = scalar_lea.vmem %s1702_s11, 256  ;;  %p1995_p1 = scmp.lt.s32.totalorder %s1702_s11, %s1702_s11 }
 0xbb7   :  { %1929 = vmatprep.subr.bf16.mxu0 %v1928_v60  ;;  %p1991_p0 = scmp.ne.s32.totalorder %s1702_s11, %s1990_s12  ;;  %p1996_p2 = scmp.lt.s32.totalorder %s1990_s12, %s1990_s12 }
 0xbb8   :  { %v1496_v21 = vsel %vm39_vm0, %v2267_v16, 0.0  ;;  %1931 = vmatpush3.bf16.msra.mxu0 %v1928_v60 }
 0xbb9   :  { %1497 = vadd.xlane.f32.xlu0 %v1496_v21  ;;  %p1997_p3 = por %p1996_p2, %p1995_p1 }
 0xbbb   :  { %p1998_p4 = pnand %p1997_p3, %p1991_p0 }
 0xbbd   :  { %1506 = vadd.xlane.f32.xlu0 %v1505_v23 }
 0xc46   :  { %v1498_v24 = vpop.xlane.xlu0 %1497 }
 0xc47   :  { %v1500_v25 = vmul.f32 0.03125, %v1498_v24 }
 0xc49   :  { %v1502_v26 = vsub.f32 %v2267_v16, %v1500_v25 }
 0xc4a   :  { %v1507_v27 = vpop.xlane.xlu0 %1506 }
 0xc4b   :  { %v1511_v28 = vmul.f32 0.03125, %v1507_v27  ;;  %v1504_v29 = vmul.f32 %v1502_v26, %v1502_v26 }
 0xc4d   :  { %v1513_v30 = vadd.f32 1e-05, %v1511_v28  ;;  %v1508_v31 = vsel %vm39_vm0, %v1504_v29, 0.0 }
 0xc4e   :  { %1509 = vadd.xlane.f32.xlu1 %v1508_v31 }
 0xc4f   :  { %1986 = vrsqrt.f32 %v1513_v30 }
 0xc59   :  { %v1987_v2 = vpop.eup %1986 }
 0xc5a   :  { %v1517_v32 = vmul.f32 %v1987_v2, %v1501_v19 }
 0xc5c   :  { %1878 = vmatprep.mubr.msk.f32.mxu1 %vm39_vm0, %v1517_v32 }
 0xcdb   :  { %v1510_v43 = vpop.xlane.xlu1 %1509 }
 0xcdc   :  { %v1512_v53 = vmul.f32 0.03125, %v1510_v43 }
 0xcde   :  { %v1514_v54 = vadd.f32 1e-05, %v1512_v53 }
 0xce0   :  { %1988 = vrsqrt.f32 %v1514_v54 }
 0xcea   :  { %v1989_v55 = vpop.eup %1988 }
 0xceb   :  { %v1518_v56 = vmul.f32 %v1989_v55, %v1502_v26 }
 0xced   :  { %1879 = vmatmul.mubr.msk.f32.vlgmr.msra.gmra.mrb[20].mxu1 %vm39_vm0, %v1518_v56 }
 0xdc0   :  { %v1880_v63 = vpop.f32.mrb[20].mxu1 }
 0xdc1   :  { %v1601_v3 = vadd.f32 %v1880_v63, %v1522_v62  ;;  %v1595_v48 = vpop.f32.mrb[21].mxu1 }
 0xdc2   :  { %v1596_v4 = vadd.f32 %v1595_v48, %v1522_v62 }
 0xdc3   :  { %v1605_v1 = vmax.f32 %v1601_v3, 0.0 }
 0xdc4   :  { %v1604_v0 = vmax.f32 %v1596_v4, 0.0 }
 0xdc6   :  { %1897 = vmatprep.mubr.msk.f32.mxu0 %vm1610_vm3, %v1604_v0 }
 0xdc7   :  { %1898 = vmatmul.mubr.msk.f32.vlgmr.msra.gmra.mrb[16].mxu0 %vm1610_vm3, %v1605_v1 }
 0xe9a   :  { %v1899_v7 = vpop.f32.mrb[16].mxu0 }
 0xe9b   :  { %v1689_v8 = vadd.f32 %v1899_v7, %v1609_v6  ;;  %v1683_v50 = vpop.f32.mrb[17].mxu0 }
 0xe9c   :  { %v1684_v9 = vadd.f32 %v1683_v50, %v1609_v6 }
 0xe9d   :  { %v1693_v10 = vadd.f32 %v1689_v8, %v2267_v16 }
 0xe9e   :  { %v1692_v11 = vadd.f32 %v1684_v9, %v2250_v59 }
 0xe9f   :  { %1695 = vst.msk [vmem:[#allocation2 + $0x8] sm:$0xff] %vm39_vm0, %v1693_v10 }
 0xea0   :  { %1694 = vst.msk [vmem:[#allocation2] sm:$0xff] %vm39_vm0, %v1692_v11 }
 0xea1   :  { %2001 = shalt.err (!%p1998_p4)
}
 0xea2   :  { %s2002_s15 = scalar_lea.hbm %s2335_s3, 256 }
 0xea3   :  { %p2003_p5 = scmp.ne.s32.totalorder %s2335_s3, %s2002_s15  ;;  %p2006_p6 = scmp.lt.u32.totalorder %s2002_s15, %s2335_s3 }
 0xea5   :  { %p2008_p7 = pnand %p2006_p6, %p2003_p5 }
 0xea7   :  { %2011 = shalt.err (!%p2008_p7)
}
 0xea8   :  { %s2026_s0 = smov 128   ;;  %s2027_s20 = smov 8  }
 0xea9   :  { %1707 = dma.vmem_to_hbm [thread:$0]  %s1702_s11, 256, %s2335_s3, [#allocation3], %s2026_s0, %s2026_s0, %s2027_s20  }
 0xeaa   :  { %2012 = dma.done.wait [#allocation3], 256  }
 0xeab   :  { %2013 = vsyncadd [#allocation3], 4294967040 }
 0xeac   :  { %1711 = vsyncpa [#allocation3], 1 }

</bundles_post_ra>
